<compile_context>
chip_gen: v7x
topology: tpu7x:2x2x1
jax: 0.10.0
libtpu: 0.0.40
codegen_flags: <defaults>
</compile_context>

<pallas_src>
import jax
import jax.numpy as jnp
from jax.experimental import pallas as pl
from jax.experimental.pallas import tpu as pltpu


CHUNK = 512  # 4 lane-tiles per accumulate step; keeps live vregs ~12 of 64.


def linear_kernel(x_ref, w_ref, b_ref, o_ref):
    """o = sum_k x[:, k] * w[0, k] + b, chunked VPU MAC + one XLU reduce."""
    B, K = x_ref.shape
    n_full = K // CHUNK
    rem = K - n_full * CHUNK

    acc = jnp.zeros((B, CHUNK), jnp.float32)

    # Fully unrolled static chunk loop: every slice start is a literal multiple
    # of 128, so all x loads are aligned, unmasked vector loads.
    for c in range(n_full):
        c0 = c * CHUNK
        xc = x_ref[:, c0:c0 + CHUNK].astype(jnp.float32)      # (B, CHUNK)
        wc = w_ref[:, c0:c0 + CHUNK].astype(jnp.float32)      # (1, CHUNK)
        acc = acc + xc * wc                                   # VPU mul + add

    s = jnp.sum(acc, axis=-1, keepdims=True)                  # one XLU lane-reduce

    if rem:  # masked partial trailing lane-tile (K not a multiple of 128/CHUNK)
        r0 = n_full * CHUNK
        xr = x_ref[:, r0:r0 + rem].astype(jnp.float32)
        wr = w_ref[:, r0:r0 + rem].astype(jnp.float32)
        s = s + jnp.sum(xr * wr, axis=-1, keepdims=True)

    o_ref[...] = (s + b_ref[0]).astype(o_ref.dtype)


@jax.jit
def apg_svm_forward(x, w, b):
    """x: (B, K) f32, w: (1, K) f32, b: (1,) f32  ->  (B, 1) f32."""
    B, K = x.shape

    cost = pl.CostEstimate(
        flops=2 * B * K,
        transcendentals=0,
        bytes_accessed=(B * K + K + 1 + B) * x.dtype.itemsize,
    )

    # NOTE(perf): at this size wall time is dominated by the fixed pallas_call
    # launch overhead + one ~320 KB DMA; amortize by batching many rows per call.
    # TODO(synk): if B grows large, add a leading "parallel" grid axis over the
    # batch (dimension_semantics) so v7x's two TensorCores split it, and re-check
    # per-buffer sizes against the 32 MiB scoped-VMEM default before raising it.
    return pl.pallas_call(
        linear_kernel,
        out_shape=jax.ShapeDtypeStruct((B, 1), x.dtype),
        in_specs=[
            pl.BlockSpec(memory_space=pltpu.MemorySpace.VMEM),   # x, full block
            pl.BlockSpec(memory_space=pltpu.MemorySpace.VMEM),   # w, full block
            pl.BlockSpec(memory_space=pltpu.MemorySpace.SMEM),   # bias scalar
        ],
        out_specs=pl.BlockSpec(memory_space=pltpu.MemorySpace.VMEM),
        cost_estimate=cost,
    )(x, w, b)


if __name__ == "__main__":
    # Module-consistent shapes: batch of 8, the module's default n_features=10000
    # (deliberately NOT a multiple of 128, exercising the unpadded/masked path).
    B = 8
    N_FEATURES = 10000

    key = jax.random.PRNGKey(0)
    kx, kw, kb = jax.random.split(key, 3)

    x = jax.random.normal(kx, (B, N_FEATURES), dtype=jnp.float32)

    # Deterministic init mimicking nn.Linear default: U(-1/sqrt(K), 1/sqrt(K)).
    bound = 1.0 / jnp.sqrt(jnp.float32(N_FEATURES))
    w = jax.random.uniform(kw, (1, N_FEATURES), jnp.float32, -bound, bound)
    b = jax.random.uniform(kb, (1,), jnp.float32, -bound, bound)

    out = jax.block_until_ready(apg_svm_forward(x, w, b))

    # Reference check (plain JAX).
    ref = x @ w.T + b
    assert out.shape == (B, 1)
    assert jnp.allclose(out, ref, atol=1e-4, rtol=1e-4), "mismatch vs reference"

    print("KERNEL_OK")
</pallas_src>

<mosaic_0001>
module attributes {stable_mosaic.version = 11 : i64} {
  func.func @linear_kernel(%arg0: memref<8x10000xf32, #tpu.memory_space<vmem>>, %arg1: memref<1x10000xf32, #tpu.memory_space<vmem>>, %arg2: memref<1xf32, #tpu.memory_space<smem>>, %arg3: memref<8x1xf32, #tpu.memory_space<vmem>>) attributes {dimension_semantics = [], scalar_prefetch = 0 : i64, scratch_operands = 0 : i64, tpu.core_type = #tpu.core_type<tc>} {
    %cst = arith.constant 0.000000e+00 : f32
    %0 = vector.broadcast %cst : f32 to vector<8x512xf32>
    %c0 = arith.constant 0 : index
    %c0_0 = arith.constant 0 : index
    %1 = vector.load %arg0[%c0, %c0_0] : memref<8x10000xf32, #tpu.memory_space<vmem>>, vector<8x512xf32>
    %c0_1 = arith.constant 0 : index
    %c0_2 = arith.constant 0 : index
    %2 = vector.load %arg1[%c0_1, %c0_2] : memref<1x10000xf32, #tpu.memory_space<vmem>>, vector<1x512xf32>
    %3 = vector.broadcast %2 : vector<1x512xf32> to vector<8x512xf32>
    %4 = arith.mulf %1, %3 : vector<8x512xf32>
    %5 = arith.addf %0, %4 : vector<8x512xf32>
    %c0_3 = arith.constant 0 : index
    %c512 = arith.constant 512 : index
    %6 = vector.load %arg0[%c0_3, %c512] : memref<8x10000xf32, #tpu.memory_space<vmem>>, vector<8x512xf32>
    %c0_4 = arith.constant 0 : index
    %c512_5 = arith.constant 512 : index
    %7 = vector.load %arg1[%c0_4, %c512_5] : memref<1x10000xf32, #tpu.memory_space<vmem>>, vector<1x512xf32>
    %8 = vector.broadcast %7 : vector<1x512xf32> to vector<8x512xf32>
    %9 = arith.mulf %6, %8 : vector<8x512xf32>
    %10 = arith.addf %5, %9 : vector<8x512xf32>
    %c0_6 = arith.constant 0 : index
    %c1024 = arith.constant 1024 : index
    %11 = vector.load %arg0[%c0_6, %c1024] : memref<8x10000xf32, #tpu.memory_space<vmem>>, vector<8x512xf32>
    %c0_7 = arith.constant 0 : index
    %c1024_8 = arith.constant 1024 : index
    %12 = vector.load %arg1[%c0_7, %c1024_8] : memref<1x10000xf32, #tpu.memory_space<vmem>>, vector<1x512xf32>
    %13 = vector.broadcast %12 : vector<1x512xf32> to vector<8x512xf32>
    %14 = arith.mulf %11, %13 : vector<8x512xf32>
    %15 = arith.addf %10, %14 : vector<8x512xf32>
    %c0_9 = arith.constant 0 : index
    %c1536 = arith.constant 1536 : index
    %16 = vector.load %arg0[%c0_9, %c1536] : memref<8x10000xf32, #tpu.memory_space<vmem>>, vector<8x512xf32>
    %c0_10 = arith.constant 0 : index
    %c1536_11 = arith.constant 1536 : index
    %17 = vector.load %arg1[%c0_10, %c1536_11] : memref<1x10000xf32, #tpu.memory_space<vmem>>, vector<1x512xf32>
    %18 = vector.broadcast %17 : vector<1x512xf32> to vector<8x512xf32>
    %19 = arith.mulf %16, %18 : vector<8x512xf32>
    %20 = arith.addf %15, %19 : vector<8x512xf32>
    %c0_12 = arith.constant 0 : index
    %c2048 = arith.constant 2048 : index
    %21 = vector.load %arg0[%c0_12, %c2048] : memref<8x10000xf32, #tpu.memory_space<vmem>>, vector<8x512xf32>
    %c0_13 = arith.constant 0 : index
    %c2048_14 = arith.constant 2048 : index
    %22 = vector.load %arg1[%c0_13, %c2048_14] : memref<1x10000xf32, #tpu.memory_space<vmem>>, vector<1x512xf32>
    %23 = vector.broadcast %22 : vector<1x512xf32> to vector<8x512xf32>
    %24 = arith.mulf %21, %23 : vector<8x512xf32>
    %25 = arith.addf %20, %24 : vector<8x512xf32>
    %c0_15 = arith.constant 0 : index
    %c2560 = arith.constant 2560 : index
    %26 = vector.load %arg0[%c0_15, %c2560] : memref<8x10000xf32, #tpu.memory_space<vmem>>, vector<8x512xf32>
    %c0_16 = arith.constant 0 : index
    %c2560_17 = arith.constant 2560 : index
    %27 = vector.load %arg1[%c0_16, %c2560_17] : memref<1x10000xf32, #tpu.memory_space<vmem>>, vector<1x512xf32>
    %28 = vector.broadcast %27 : vector<1x512xf32> to vector<8x512xf32>
    %29 = arith.mulf %26, %28 : vector<8x512xf32>
    %30 = arith.addf %25, %29 : vector<8x512xf32>
    %c0_18 = arith.constant 0 : index
    %c3072 = arith.constant 3072 : index
    %31 = vector.load %arg0[%c0_18, %c3072] : memref<8x10000xf32, #tpu.memory_space<vmem>>, vector<8x512xf32>
    %c0_19 = arith.constant 0 : index
    %c3072_20 = arith.constant 3072 : index
    %32 = vector.load %arg1[%c0_19, %c3072_20] : memref<1x10000xf32, #tpu.memory_space<vmem>>, vector<1x512xf32>
    %33 = vector.broadcast %32 : vector<1x512xf32> to vector<8x512xf32>
    %34 = arith.mulf %31, %33 : vector<8x512xf32>
    %35 = arith.addf %30, %34 : vector<8x512xf32>
    %c0_21 = arith.constant 0 : index
    %c3584 = arith.constant 3584 : index
    %36 = vector.load %arg0[%c0_21, %c3584] : memref<8x10000xf32, #tpu.memory_space<vmem>>, vector<8x512xf32>
    %c0_22 = arith.constant 0 : index
    %c3584_23 = arith.constant 3584 : index
    %37 = vector.load %arg1[%c0_22, %c3584_23] : memref<1x10000xf32, #tpu.memory_space<vmem>>, vector<1x512xf32>
    %38 = vector.broadcast %37 : vector<1x512xf32> to vector<8x512xf32>
    %39 = arith.mulf %36, %38 : vector<8x512xf32>
    %40 = arith.addf %35, %39 : vector<8x512xf32>
    %c0_24 = arith.constant 0 : index
    %c4096 = arith.constant 4096 : index
    %41 = vector.load %arg0[%c0_24, %c4096] : memref<8x10000xf32, #tpu.memory_space<vmem>>, vector<8x512xf32>
    %c0_25 = arith.constant 0 : index
    %c4096_26 = arith.constant 4096 : index
    %42 = vector.load %arg1[%c0_25, %c4096_26] : memref<1x10000xf32, #tpu.memory_space<vmem>>, vector<1x512xf32>
    %43 = vector.broadcast %42 : vector<1x512xf32> to vector<8x512xf32>
    %44 = arith.mulf %41, %43 : vector<8x512xf32>
    %45 = arith.addf %40, %44 : vector<8x512xf32>
    %c0_27 = arith.constant 0 : index
    %c4608 = arith.constant 4608 : index
    %46 = vector.load %arg0[%c0_27, %c4608] : memref<8x10000xf32, #tpu.memory_space<vmem>>, vector<8x512xf32>
    %c0_28 = arith.constant 0 : index
    %c4608_29 = arith.constant 4608 : index
    %47 = vector.load %arg1[%c0_28, %c4608_29] : memref<1x10000xf32, #tpu.memory_space<vmem>>, vector<1x512xf32>
    %48 = vector.broadcast %47 : vector<1x512xf32> to vector<8x512xf32>
    %49 = arith.mulf %46, %48 : vector<8x512xf32>
    %50 = arith.addf %45, %49 : vector<8x512xf32>
    %c0_30 = arith.constant 0 : index
    %c5120 = arith.constant 5120 : index
    %51 = vector.load %arg0[%c0_30, %c5120] : memref<8x10000xf32, #tpu.memory_space<vmem>>, vector<8x512xf32>
    %c0_31 = arith.constant 0 : index
    %c5120_32 = arith.constant 5120 : index
    %52 = vector.load %arg1[%c0_31, %c5120_32] : memref<1x10000xf32, #tpu.memory_space<vmem>>, vector<1x512xf32>
    %53 = vector.broadcast %52 : vector<1x512xf32> to vector<8x512xf32>
    %54 = arith.mulf %51, %53 : vector<8x512xf32>
    %55 = arith.addf %50, %54 : vector<8x512xf32>
    %c0_33 = arith.constant 0 : index
    %c5632 = arith.constant 5632 : index
    %56 = vector.load %arg0[%c0_33, %c5632] : memref<8x10000xf32, #tpu.memory_space<vmem>>, vector<8x512xf32>
    %c0_34 = arith.constant 0 : index
    %c5632_35 = arith.constant 5632 : index
    %57 = vector.load %arg1[%c0_34, %c5632_35] : memref<1x10000xf32, #tpu.memory_space<vmem>>, vector<1x512xf32>
    %58 = vector.broadcast %57 : vector<1x512xf32> to vector<8x512xf32>
    %59 = arith.mulf %56, %58 : vector<8x512xf32>
    %60 = arith.addf %55, %59 : vector<8x512xf32>
    %c0_36 = arith.constant 0 : index
    %c6144 = arith.constant 6144 : index
    %61 = vector.load %arg0[%c0_36, %c6144] : memref<8x10000xf32, #tpu.memory_space<vmem>>, vector<8x512xf32>
    %c0_37 = arith.constant 0 : index
    %c6144_38 = arith.constant 6144 : index
    %62 = vector.load %arg1[%c0_37, %c6144_38] : memref<1x10000xf32, #tpu.memory_space<vmem>>, vector<1x512xf32>
    %63 = vector.broadcast %62 : vector<1x512xf32> to vector<8x512xf32>
    %64 = arith.mulf %61, %63 : vector<8x512xf32>
    %65 = arith.addf %60, %64 : vector<8x512xf32>
    %c0_39 = arith.constant 0 : index
    %c6656 = arith.constant 6656 : index
    %66 = vector.load %arg0[%c0_39, %c6656] : memref<8x10000xf32, #tpu.memory_space<vmem>>, vector<8x512xf32>
    %c0_40 = arith.constant 0 : index
    %c6656_41 = arith.constant 6656 : index
    %67 = vector.load %arg1[%c0_40, %c6656_41] : memref<1x10000xf32, #tpu.memory_space<vmem>>, vector<1x512xf32>
    %68 = vector.broadcast %67 : vector<1x512xf32> to vector<8x512xf32>
    %69 = arith.mulf %66, %68 : vector<8x512xf32>
    %70 = arith.addf %65, %69 : vector<8x512xf32>
    %c0_42 = arith.constant 0 : index
    %c7168 = arith.constant 7168 : index
    %71 = vector.load %arg0[%c0_42, %c7168] : memref<8x10000xf32, #tpu.memory_space<vmem>>, vector<8x512xf32>
    %c0_43 = arith.constant 0 : index
    %c7168_44 = arith.constant 7168 : index
    %72 = vector.load %arg1[%c0_43, %c7168_44] : memref<1x10000xf32, #tpu.memory_space<vmem>>, vector<1x512xf32>
    %73 = vector.broadcast %72 : vector<1x512xf32> to vector<8x512xf32>
    %74 = arith.mulf %71, %73 : vector<8x512xf32>
    %75 = arith.addf %70, %74 : vector<8x512xf32>
    %c0_45 = arith.constant 0 : index
    %c7680 = arith.constant 7680 : index
    %76 = vector.load %arg0[%c0_45, %c7680] : memref<8x10000xf32, #tpu.memory_space<vmem>>, vector<8x512xf32>
    %c0_46 = arith.constant 0 : index
    %c7680_47 = arith.constant 7680 : index
    %77 = vector.load %arg1[%c0_46, %c7680_47] : memref<1x10000xf32, #tpu.memory_space<vmem>>, vector<1x512xf32>
    %78 = vector.broadcast %77 : vector<1x512xf32> to vector<8x512xf32>
    %79 = arith.mulf %76, %78 : vector<8x512xf32>
    %80 = arith.addf %75, %79 : vector<8x512xf32>
    %c0_48 = arith.constant 0 : index
    %c8192 = arith.constant 8192 : index
    %81 = vector.load %arg0[%c0_48, %c8192] : memref<8x10000xf32, #tpu.memory_space<vmem>>, vector<8x512xf32>
    %c0_49 = arith.constant 0 : index
    %c8192_50 = arith.constant 8192 : index
    %82 = vector.load %arg1[%c0_49, %c8192_50] : memref<1x10000xf32, #tpu.memory_space<vmem>>, vector<1x512xf32>
    %83 = vector.broadcast %82 : vector<1x512xf32> to vector<8x512xf32>
    %84 = arith.mulf %81, %83 : vector<8x512xf32>
    %85 = arith.addf %80, %84 : vector<8x512xf32>
    %c0_51 = arith.constant 0 : index
    %c8704 = arith.constant 8704 : index
    %86 = vector.load %arg0[%c0_51, %c8704] : memref<8x10000xf32, #tpu.memory_space<vmem>>, vector<8x512xf32>
    %c0_52 = arith.constant 0 : index
    %c8704_53 = arith.constant 8704 : index
    %87 = vector.load %arg1[%c0_52, %c8704_53] : memref<1x10000xf32, #tpu.memory_space<vmem>>, vector<1x512xf32>
    %88 = vector.broadcast %87 : vector<1x512xf32> to vector<8x512xf32>
    %89 = arith.mulf %86, %88 : vector<8x512xf32>
    %90 = arith.addf %85, %89 : vector<8x512xf32>
    %c0_54 = arith.constant 0 : index
    %c9216 = arith.constant 9216 : index
    %91 = vector.load %arg0[%c0_54, %c9216] : memref<8x10000xf32, #tpu.memory_space<vmem>>, vector<8x512xf32>
    %c0_55 = arith.constant 0 : index
    %c9216_56 = arith.constant 9216 : index
    %92 = vector.load %arg1[%c0_55, %c9216_56] : memref<1x10000xf32, #tpu.memory_space<vmem>>, vector<1x512xf32>
    %93 = vector.broadcast %92 : vector<1x512xf32> to vector<8x512xf32>
    %94 = arith.mulf %91, %93 : vector<8x512xf32>
    %95 = arith.addf %90, %94 : vector<8x512xf32>
    %cst_57 = arith.constant dense<0.000000e+00> : vector<8xf32>
    %96 = vector.multi_reduction <add>, %95, %cst_57 [1] : vector<8x512xf32> to vector<8xf32>
    %97 = vector.shape_cast %96 : vector<8xf32> to vector<8x1xf32>
    %c0_58 = arith.constant 0 : index
    %c9728 = arith.constant 9728 : index
    %98 = vector.load %arg0[%c0_58, %c9728] : memref<8x10000xf32, #tpu.memory_space<vmem>>, vector<8x272xf32>
    %c0_59 = arith.constant 0 : index
    %c9728_60 = arith.constant 9728 : index
    %99 = vector.load %arg1[%c0_59, %c9728_60] : memref<1x10000xf32, #tpu.memory_space<vmem>>, vector<1x272xf32>
    %100 = vector.broadcast %99 : vector<1x272xf32> to vector<8x272xf32>
    %101 = arith.mulf %98, %100 : vector<8x272xf32>
    %cst_61 = arith.constant dense<0.000000e+00> : vector<8xf32>
    %102 = vector.multi_reduction <add>, %101, %cst_61 [1] : vector<8x272xf32> to vector<8xf32>
    %103 = vector.shape_cast %102 : vector<8xf32> to vector<8x1xf32>
    %104 = arith.addf %97, %103 : vector<8x1xf32>
    %c0_62 = arith.constant 0 : index
    %105 = memref.load %arg2[%c0_62] : memref<1xf32, #tpu.memory_space<smem>>
    %106 = vector.broadcast %105 : f32 to vector<8x1xf32>
    %107 = arith.addf %104, %106 : vector<8x1xf32>
    %c0_63 = arith.constant 0 : index
    %c0_64 = arith.constant 0 : index
    %108 = vector.load %arg3[%c0_63, %c0_64] : memref<8x1xf32, #tpu.memory_space<vmem>>, vector<8x1xf32>
    tpu.vector_store %arg3[%c0_63, %c0_64], %107 {strides = array<i32>} : memref<8x1xf32, #tpu.memory_space<vmem>>, vector<8x1xf32>,
    return
  }
}

</mosaic_0001>

<bundles_post_ra>
// kernel: apg_svm_forward.1
= control target key start
LH: loop header
LB: loop body
LE: loop exit
PB: predicated region body
PF: predicated region fallthrough
CT: control target
= control target key end

     0   :  { %9 = vsyncpa [#allocation4], 0  ;;  %s920_s0 = inlined_call_operand.hbm [shape: f32[8,10000], index: 0, kind: input, shape index: {}]   ;;  %s921_s1 = inlined_call_operand.hbm [shape: f32[1,10000], index: 1, kind: input, shape index: {}]   ;;  %s922_s2 = inlined_call_operand.<no memory space> [shape: f32[1], index: 2, kind: input, shape index: {}]   ;;  %s923_s3 = inlined_call_operand.vmem [shape: f32[8,1], index: 3, kind: output, shape index: {}]  }
   0x1   :  { %10 = vsyncpa [#allocation6], 0  ;;  %s781_s12 = smov [#allocation3]   ;;  %s782_s14 = smov [#allocation5]  }
   0x2   :  { %s17_s13 = sshll.u32 %s781_s12, 4  ;;  %s27_s15 = sshll.u32 %s782_s14, 4  ;;  %s18_s13 = int_to_ptr.vmem [resolvable:$true] %s17_s13  ;;  %s28_s15 = int_to_ptr.vmem [resolvable:$true] %s27_s15 }
   0x3   :  { %s733_s18 = scalar_lea.hbm %s920_s0, 10112 }
   0x4   :  { %p734_p0 = scmp.ne.s32.totalorder %s920_s0, %s733_s18  ;;  %p737_p1 = scmp.lt.u32.totalorder %s733_s18, %s920_s0 }
   0x6   :  { %p739_p2 = pnand %p737_p1, %p734_p0 }
   0x8   :  { %742 = shalt.err (!%p739_p2)
}
   0x9   :  { %s743_s23 = scalar_lea.vmem %s18_s13, 10112  ;;  %p748_p4 = scmp.lt.s32.totalorder %s18_s13, %s18_s13 }
   0xa   :  { %p744_p3 = scmp.ne.s32.totalorder %s18_s13, %s743_s23  ;;  %p749_p5 = scmp.lt.s32.totalorder %s743_s23, %s743_s23 }
   0xc   :  { %p750_p6 = por %p749_p5, %p748_p4 }
   0xe   :  { %p751_p7 = pnand %p750_p6, %p744_p3 }
  0x10   :  { %754 = shalt.err (!%p751_p7)
}
  0x11   :  { %20 = dma.hbm_to_vmem [thread:$0]  %s920_s0, 10112, %s18_s13, [#allocation4]  }
  0x12   :  { %s755_s28 = scalar_lea.hbm %s921_s1, 1264 }
  0x13   :  { %p756_p8 = scmp.ne.s32.totalorder %s921_s1, %s755_s28  ;;  %p759_p9 = scmp.lt.u32.totalorder %s755_s28, %s921_s1 }
  0x15   :  { %p761_p10 = pnand %p759_p9, %p756_p8 }
  0x17   :  { %764 = shalt.err (!%p761_p10)
}
  0x18   :  { %s765_s6 = scalar_lea.vmem %s28_s15, 1264  ;;  %s769_s7 = scalar_lea.vmem %s28_s15, 1280 }
  0x19   :  { %p766_p11 = scmp.ne.s32.totalorder %s28_s15, %s765_s6  ;;  %p770_p12 = scmp.lt.s32.totalorder %s28_s15, %s28_s15 }
  0x1a   :  { %p771_p13 = scmp.lt.s32.totalorder %s769_s7, %s765_s6 }
  0x1c   :  { %p772_p0 = por %p771_p13, %p770_p12 }
  0x1e   :  { %p773_p1 = pnand %p772_p0, %p766_p11 }
  0x20   :  { %776 = shalt.err (!%p773_p1)
}
  0x21   :  { %30 = dma.hbm_to_vmem [thread:$0]  %s921_s1, 1264, %s28_s15, [#allocation6]  }
  0x22   :  { %777 = dma.done.wait [#allocation4], 10112  }
  0x23   :  { %778 = vsyncadd [#allocation4], 4294957184 }
  0x24   :  { %779 = dma.done.wait [#allocation6], 1264  }
  0x25   :  { %780 = vsyncadd [#allocation6], 4294966032  ;;  %v45_v0 = vlaneseq  ;;  %v39_v6 = vld [vmem:[#allocation3] sm:$0xff]  ;;  %v40_v7 = vld [vmem:[#allocation3 + $0x8] sm:$0xff]  ;;  %vm714_vm0 = vcmask 130048   ;;  %vm723_vm1 = vcmask 7168  }
  0x26   :  { %v41_v8 = vld [vmem:[#allocation3 + $0x10] sm:$0xff]  ;;  %v42_v9 = vld [vmem:[#allocation3 + $0x18] sm:$0xff]  ;;  %v73_v15 = vld [vmem:[#allocation3 + $0x20] sm:$0xff] }
  0x27   :  { %v46_v1 = vshrl.u32 %v45_v0, 7  ;;  %v43_v10 = vld [vmem:[#allocation5] sm:$0xf]  ;;  %v74_v16 = vld [vmem:[#allocation3 + $0x28] sm:$0xff]  ;;  %v75_v17 = vld [vmem:[#allocation3 + $0x30] sm:$0xff] }
  0x28   :  { %v77_v18 = vld [vmem:[#allocation5 + $0x4] sm:$0xf]  ;;  %v107_v24 = vld [vmem:[#allocation3 + $0x40] sm:$0xff]  ;;  %v108_v30 = vld [vmem:[#allocation3 + $0x48] sm:$0xff] }
  0x29   :  { %v827_v2 = vsub.s32 0, %v46_v1  ;;  %v829_v3 = vsub.s32 1, %v46_v1  ;;  %v831_v4 = vsub.s32 2, %v46_v1  ;;  %v833_v5 = vsub.s32 3, %v46_v1  ;;  %v76_v23 = vld [vmem:[#allocation3 + $0x38] sm:$0xff]  ;;  %v109_v31 = vld [vmem:[#allocation3 + $0x50] sm:$0xff] }
  0x2a   :  { %v111_v25 = vld [vmem:[#allocation5 + $0x8] sm:$0xf]  ;;  %v110_v32 = vld [vmem:[#allocation3 + $0x58] sm:$0xff]  ;;  %v145_v41 = vld [vmem:[#allocation5 + $0xc] sm:$0xf] }
  0x2b   :  { %v48_v11 = vrot.slane %v43_v10, %v827_v2  ;;  %v52_v12 = vrot.slane %v43_v10, %v829_v3  ;;  %v56_v13 = vrot.slane %v43_v10, %v831_v4  ;;  %v60_v14 = vrot.slane %v43_v10, %v833_v5  ;;  %v141_v46 = vld [vmem:[#allocation3 + $0x60] sm:$0xff]  ;;  %v142_v51 = vld [vmem:[#allocation3 + $0x68] sm:$0xff]  ;;  %v143_v52 = vld [vmem:[#allocation3 + $0x70] sm:$0xff] }
  0x2c   :  { %v82_v26 = vrot.slane %v77_v18, %v827_v2  ;;  %v86_v27 = vrot.slane %v77_v18, %v829_v3  ;;  %v90_v28 = vrot.slane %v77_v18, %v831_v4  ;;  %v94_v29 = vrot.slane %v77_v18, %v833_v5  ;;  %v144_v53 = vld [vmem:[#allocation3 + $0x78] sm:$0xff]  ;;  %v179_v58 = vld [vmem:[#allocation5 + $0x10] sm:$0xf]  ;;  %v175_v63 = vld [vmem:[#allocation3 + $0x80] sm:$0xff] }
  0x2d   :  { %v65_v19 = vmul.f32 %v48_v11, %v39_v6  ;;  %v66_v20 = vmul.f32 %v52_v12, %v40_v7  ;;  %v67_v21 = vmul.f32 %v56_v13, %v41_v8  ;;  %v68_v22 = vmul.f32 %v60_v14, %v42_v9  ;;  %v176_v8 = vld [vmem:[#allocation3 + $0x88] sm:$0xff]  ;;  %v177_v9 = vld [vmem:[#allocation3 + $0x90] sm:$0xff]  ;;  %v178_v10 = vld [vmem:[#allocation3 + $0x98] sm:$0xff] }
  0x2e   :  { %v116_v33 = vrot.slane %v111_v25, %v827_v2  ;;  %v120_v34 = vrot.slane %v111_v25, %v829_v3  ;;  %v124_v35 = vrot.slane %v111_v25, %v831_v4  ;;  %v128_v36 = vrot.slane %v111_v25, %v833_v5  ;;  %v210_v25 = vld [vmem:[#allocation3 + $0xa8] sm:$0xff] }
  0x2f   :  { %v99_v37 = vmul.f32 %v82_v26, %v73_v15  ;;  %v100_v38 = vmul.f32 %v86_v27, %v74_v16  ;;  %v101_v39 = vmul.f32 %v90_v28, %v75_v17  ;;  %v102_v40 = vmul.f32 %v94_v29, %v76_v23  ;;  %v213_v15 = vld [vmem:[#allocation5 + $0x14] sm:$0xf]  ;;  %v211_v26 = vld [vmem:[#allocation3 + $0xb0] sm:$0xff]  ;;  %v212_v27 = vld [vmem:[#allocation3 + $0xb8] sm:$0xff] }
  0x30   :  { %v133_v42 = vmul.f32 %v116_v33, %v107_v24  ;;  %v134_v43 = vmul.f32 %v120_v34, %v108_v30  ;;  %v135_v44 = vmul.f32 %v124_v35, %v109_v31  ;;  %v136_v45 = vmul.f32 %v128_v36, %v110_v32  ;;  %v247_v32 = vld [vmem:[#allocation5 + $0x18] sm:$0xf] }
  0x31   :  { %v103_v47 = vadd.f32 %v99_v37, %v65_v19  ;;  %v104_v48 = vadd.f32 %v100_v38, %v66_v20  ;;  %v105_v49 = vadd.f32 %v101_v39, %v67_v21  ;;  %v106_v50 = vadd.f32 %v102_v40, %v68_v22  ;;  %v209_v20 = vld [vmem:[#allocation3 + $0xa0] sm:$0xff] }
  0x32   :  { %v150_v54 = vrot.slane %v145_v41, %v827_v2  ;;  %v154_v55 = vrot.slane %v145_v41, %v829_v3  ;;  %v158_v56 = vrot.slane %v145_v41, %v831_v4  ;;  %v162_v57 = vrot.slane %v145_v41, %v833_v5  ;;  %v243_v37 = vld [vmem:[#allocation3 + $0xc0] sm:$0xff] }
  0x33   :  { %v137_v59 = vadd.f32 %v133_v42, %v103_v47  ;;  %v138_v60 = vadd.f32 %v134_v43, %v104_v48  ;;  %v139_v61 = vadd.f32 %v135_v44, %v105_v49  ;;  %v140_v62 = vadd.f32 %v136_v45, %v106_v50  ;;  %v244_v42 = vld [vmem:[#allocation3 + $0xc8] sm:$0xff]  ;;  %v245_v43 = vld [vmem:[#allocation3 + $0xd0] sm:$0xff]  ;;  %v246_v44 = vld [vmem:[#allocation3 + $0xd8] sm:$0xff] }
  0x34   :  { %v167_v0 = vmul.f32 %v150_v54, %v141_v46  ;;  %v168_v1 = vmul.f32 %v154_v55, %v142_v51  ;;  %v169_v6 = vmul.f32 %v158_v56, %v143_v52  ;;  %v170_v7 = vmul.f32 %v162_v57, %v144_v53  ;;  %v281_v49 = vld [vmem:[#allocation5 + $0x1c] sm:$0xf]  ;;  %v277_v54 = vld [vmem:[#allocation3 + $0xe0] sm:$0xff] }
  0x35   :  { %v184_v11 = vrot.slane %v179_v58, %v827_v2  ;;  %v188_v12 = vrot.slane %v179_v58, %v829_v3  ;;  %v192_v13 = vrot.slane %v179_v58, %v831_v4  ;;  %v196_v14 = vrot.slane %v179_v58, %v833_v5 }
  0x36   :  { %v171_v16 = vadd.f32 %v167_v0, %v137_v59  ;;  %v172_v17 = vadd.f32 %v168_v1, %v138_v60  ;;  %v173_v18 = vadd.f32 %v169_v6, %v139_v61  ;;  %v174_v19 = vadd.f32 %v170_v7, %v140_v62  ;;  %v278_v59 = vld [vmem:[#allocation3 + $0xe8] sm:$0xff]  ;;  %v279_v60 = vld [vmem:[#allocation3 + $0xf0] sm:$0xff]  ;;  %v280_v61 = vld [vmem:[#allocation3 + $0xf8] sm:$0xff] }
  0x37   :  { %v201_v21 = vmul.f32 %v184_v11, %v175_v63  ;;  %v202_v22 = vmul.f32 %v188_v12, %v176_v8  ;;  %v203_v23 = vmul.f32 %v192_v13, %v177_v9  ;;  %v204_v24 = vmul.f32 %v196_v14, %v178_v10  ;;  %v315_v6 = vld [vmem:[#allocation5 + $0x20] sm:$0xf]  ;;  %v311_v11 = vld [vmem:[#allocation3 + $0x100] sm:$0xff] }
  0x38   :  { %v218_v28 = vrot.slane %v213_v15, %v827_v2  ;;  %v222_v29 = vrot.slane %v213_v15, %v829_v3  ;;  %v226_v30 = vrot.slane %v213_v15, %v831_v4  ;;  %v230_v31 = vrot.slane %v213_v15, %v833_v5 }
  0x39   :  { %v205_v33 = vadd.f32 %v201_v21, %v171_v16  ;;  %v206_v34 = vadd.f32 %v202_v22, %v172_v17  ;;  %v207_v35 = vadd.f32 %v203_v23, %v173_v18  ;;  %v208_v36 = vadd.f32 %v204_v24, %v174_v19  ;;  %v312_v16 = vld [vmem:[#allocation3 + $0x108] sm:$0xff]  ;;  %v313_v17 = vld [vmem:[#allocation3 + $0x110] sm:$0xff]  ;;  %v314_v18 = vld [vmem:[#allocation3 + $0x118] sm:$0xff] }
  0x3a   :  { %v235_v38 = vmul.f32 %v218_v28, %v209_v20  ;;  %v236_v39 = vmul.f32 %v222_v29, %v210_v25  ;;  %v237_v40 = vmul.f32 %v226_v30, %v211_v26  ;;  %v238_v41 = vmul.f32 %v230_v31, %v212_v27  ;;  %v349_v23 = vld [vmem:[#allocation5 + $0x24] sm:$0xf]  ;;  %v345_v28 = vld [vmem:[#allocation3 + $0x120] sm:$0xff] }
  0x3b   :  { %v252_v45 = vrot.slane %v247_v32, %v827_v2  ;;  %v256_v46 = vrot.slane %v247_v32, %v829_v3  ;;  %v260_v47 = vrot.slane %v247_v32, %v831_v4  ;;  %v264_v48 = vrot.slane %v247_v32, %v833_v5 }
  0x3c   :  { %v239_v50 = vadd.f32 %v235_v38, %v205_v33  ;;  %v240_v51 = vadd.f32 %v236_v39, %v206_v34  ;;  %v241_v52 = vadd.f32 %v237_v40, %v207_v35  ;;  %v242_v53 = vadd.f32 %v238_v41, %v208_v36  ;;  %v346_v33 = vld [vmem:[#allocation3 + $0x128] sm:$0xff]  ;;  %v347_v34 = vld [vmem:[#allocation3 + $0x130] sm:$0xff]  ;;  %v348_v35 = vld [vmem:[#allocation3 + $0x138] sm:$0xff] }
  0x3d   :  { %v269_v55 = vmul.f32 %v252_v45, %v243_v37  ;;  %v270_v56 = vmul.f32 %v256_v46, %v244_v42  ;;  %v271_v57 = vmul.f32 %v260_v47, %v245_v43  ;;  %v272_v58 = vmul.f32 %v264_v48, %v246_v44  ;;  %v383_v40 = vld [vmem:[#allocation5 + $0x28] sm:$0xf] }
  0x3e   :  { %v286_v62 = vrot.slane %v281_v49, %v827_v2  ;;  %v290_v63 = vrot.slane %v281_v49, %v829_v3  ;;  %v294_v0 = vrot.slane %v281_v49, %v831_v4  ;;  %v298_v1 = vrot.slane %v281_v49, %v833_v5  ;;  %v379_v45 = vld [vmem:[#allocation3 + $0x140] sm:$0xff] }
  0x3f   :  { %v273_v7 = vadd.f32 %v269_v55, %v239_v50  ;;  %v274_v8 = vadd.f32 %v270_v56, %v240_v51  ;;  %v275_v9 = vadd.f32 %v271_v57, %v241_v52  ;;  %v276_v10 = vadd.f32 %v272_v58, %v242_v53  ;;  %v380_v50 = vld [vmem:[#allocation3 + $0x148] sm:$0xff]  ;;  %v381_v51 = vld [vmem:[#allocation3 + $0x150] sm:$0xff]  ;;  %v382_v52 = vld [vmem:[#allocation3 + $0x158] sm:$0xff] }
  0x40   :  { %v303_v12 = vmul.f32 %v286_v62, %v277_v54  ;;  %v304_v13 = vmul.f32 %v290_v63, %v278_v59  ;;  %v305_v14 = vmul.f32 %v294_v0, %v279_v60  ;;  %v306_v15 = vmul.f32 %v298_v1, %v280_v61  ;;  %v417_v57 = vld [vmem:[#allocation5 + $0x2c] sm:$0xf] }
  0x41   :  { %v320_v19 = vrot.slane %v315_v6, %v827_v2  ;;  %v324_v20 = vrot.slane %v315_v6, %v829_v3  ;;  %v328_v21 = vrot.slane %v315_v6, %v831_v4  ;;  %v332_v22 = vrot.slane %v315_v6, %v833_v5  ;;  %v413_v62 = vld [vmem:[#allocation3 + $0x160] sm:$0xff] }
  0x42   :  { %v307_v24 = vadd.f32 %v303_v12, %v273_v7  ;;  %v308_v25 = vadd.f32 %v304_v13, %v274_v8  ;;  %v309_v26 = vadd.f32 %v305_v14, %v275_v9  ;;  %v310_v27 = vadd.f32 %v306_v15, %v276_v10  ;;  %v414_v7 = vld [vmem:[#allocation3 + $0x168] sm:$0xff]  ;;  %v415_v8 = vld [vmem:[#allocation3 + $0x170] sm:$0xff]  ;;  %v416_v9 = vld [vmem:[#allocation3 + $0x178] sm:$0xff] }
  0x43   :  { %v337_v29 = vmul.f32 %v320_v19, %v311_v11  ;;  %v338_v30 = vmul.f32 %v324_v20, %v312_v16  ;;  %v339_v31 = vmul.f32 %v328_v21, %v313_v17  ;;  %v340_v32 = vmul.f32 %v332_v22, %v314_v18  ;;  %v451_v14 = vld [vmem:[#allocation5 + $0x30] sm:$0xf]  ;;  %v447_v19 = vld [vmem:[#allocation3 + $0x180] sm:$0xff] }
  0x44   :  { %v354_v36 = vrot.slane %v349_v23, %v827_v2  ;;  %v358_v37 = vrot.slane %v349_v23, %v829_v3  ;;  %v362_v38 = vrot.slane %v349_v23, %v831_v4  ;;  %v366_v39 = vrot.slane %v349_v23, %v833_v5 }
  0x45   :  { %v341_v41 = vadd.f32 %v337_v29, %v307_v24  ;;  %v342_v42 = vadd.f32 %v338_v30, %v308_v25  ;;  %v343_v43 = vadd.f32 %v339_v31, %v309_v26  ;;  %v344_v44 = vadd.f32 %v340_v32, %v310_v27  ;;  %v448_v24 = vld [vmem:[#allocation3 + $0x188] sm:$0xff]  ;;  %v449_v25 = vld [vmem:[#allocation3 + $0x190] sm:$0xff]  ;;  %v450_v26 = vld [vmem:[#allocation3 + $0x198] sm:$0xff] }
  0x46   :  { %v371_v46 = vmul.f32 %v354_v36, %v345_v28  ;;  %v372_v47 = vmul.f32 %v358_v37, %v346_v33  ;;  %v373_v48 = vmul.f32 %v362_v38, %v347_v34  ;;  %v374_v49 = vmul.f32 %v366_v39, %v348_v35  ;;  %v485_v31 = vld [vmem:[#allocation5 + $0x34] sm:$0xf]  ;;  %v481_v36 = vld [vmem:[#allocation3 + $0x1a0] sm:$0xff] }
  0x47   :  { %v388_v53 = vrot.slane %v383_v40, %v827_v2  ;;  %v392_v54 = vrot.slane %v383_v40, %v829_v3  ;;  %v396_v55 = vrot.slane %v383_v40, %v831_v4  ;;  %v400_v56 = vrot.slane %v383_v40, %v833_v5 }
  0x48   :  { %v375_v58 = vadd.f32 %v371_v46, %v341_v41  ;;  %v376_v59 = vadd.f32 %v372_v47, %v342_v42  ;;  %v377_v60 = vadd.f32 %v373_v48, %v343_v43  ;;  %v378_v61 = vadd.f32 %v374_v49, %v344_v44  ;;  %v482_v41 = vld [vmem:[#allocation3 + $0x1a8] sm:$0xff]  ;;  %v483_v42 = vld [vmem:[#allocation3 + $0x1b0] sm:$0xff]  ;;  %v484_v43 = vld [vmem:[#allocation3 + $0x1b8] sm:$0xff] }
  0x49   :  { %v405_v63 = vmul.f32 %v388_v53, %v379_v45  ;;  %v406_v0 = vmul.f32 %v392_v54, %v380_v50  ;;  %v407_v1 = vmul.f32 %v396_v55, %v381_v51  ;;  %v408_v6 = vmul.f32 %v400_v56, %v382_v52  ;;  %v519_v48 = vld [vmem:[#allocation5 + $0x38] sm:$0xf]  ;;  %v515_v53 = vld [vmem:[#allocation3 + $0x1c0] sm:$0xff] }
  0x4a   :  { %v422_v10 = vrot.slane %v417_v57, %v827_v2  ;;  %v426_v11 = vrot.slane %v417_v57, %v829_v3  ;;  %v430_v12 = vrot.slane %v417_v57, %v831_v4  ;;  %v434_v13 = vrot.slane %v417_v57, %v833_v5 }
  0x4b   :  { %v409_v15 = vadd.f32 %v405_v63, %v375_v58  ;;  %v410_v16 = vadd.f32 %v406_v0, %v376_v59  ;;  %v411_v17 = vadd.f32 %v407_v1, %v377_v60  ;;  %v412_v18 = vadd.f32 %v408_v6, %v378_v61  ;;  %v516_v58 = vld [vmem:[#allocation3 + $0x1c8] sm:$0xff]  ;;  %v517_v59 = vld [vmem:[#allocation3 + $0x1d0] sm:$0xff]  ;;  %v518_v60 = vld [vmem:[#allocation3 + $0x1d8] sm:$0xff] }
  0x4c   :  { %v439_v20 = vmul.f32 %v422_v10, %v413_v62  ;;  %v440_v21 = vmul.f32 %v426_v11, %v414_v7  ;;  %v441_v22 = vmul.f32 %v430_v12, %v415_v8  ;;  %v442_v23 = vmul.f32 %v434_v13, %v416_v9  ;;  %v553_v1 = vld [vmem:[#allocation5 + $0x3c] sm:$0xf]  ;;  %v549_v10 = vld [vmem:[#allocation3 + $0x1e0] sm:$0xff] }
  0x4d   :  { %v456_v27 = vrot.slane %v451_v14, %v827_v2  ;;  %v460_v28 = vrot.slane %v451_v14, %v829_v3  ;;  %v464_v29 = vrot.slane %v451_v14, %v831_v4  ;;  %v468_v30 = vrot.slane %v451_v14, %v833_v5 }
  0x4e   :  { %v443_v32 = vadd.f32 %v439_v20, %v409_v15  ;;  %v444_v33 = vadd.f32 %v440_v21, %v410_v16  ;;  %v445_v34 = vadd.f32 %v441_v22, %v411_v17  ;;  %v446_v35 = vadd.f32 %v442_v23, %v412_v18  ;;  %v550_v15 = vld [vmem:[#allocation3 + $0x1e8] sm:$0xff]  ;;  %v551_v16 = vld [vmem:[#allocation3 + $0x1f0] sm:$0xff]  ;;  %v552_v17 = vld [vmem:[#allocation3 + $0x1f8] sm:$0xff] }
  0x4f   :  { %v473_v37 = vmul.f32 %v456_v27, %v447_v19  ;;  %v474_v38 = vmul.f32 %v460_v28, %v448_v24  ;;  %v475_v39 = vmul.f32 %v464_v29, %v449_v25  ;;  %v476_v40 = vmul.f32 %v468_v30, %v450_v26  ;;  %v587_v22 = vld [vmem:[#allocation5 + $0x40] sm:$0xf]  ;;  %v583_v27 = vld [vmem:[#allocation3 + $0x200] sm:$0xff] }
  0x50   :  { %v490_v44 = vrot.slane %v485_v31, %v827_v2  ;;  %v494_v45 = vrot.slane %v485_v31, %v829_v3  ;;  %v498_v46 = vrot.slane %v485_v31, %v831_v4  ;;  %v502_v47 = vrot.slane %v485_v31, %v833_v5 }
  0x51   :  { %v477_v49 = vadd.f32 %v473_v37, %v443_v32  ;;  %v478_v50 = vadd.f32 %v474_v38, %v444_v33  ;;  %v479_v51 = vadd.f32 %v475_v39, %v445_v34  ;;  %v480_v52 = vadd.f32 %v476_v40, %v446_v35  ;;  %v584_v32 = vld [vmem:[#allocation3 + $0x208] sm:$0xff]  ;;  %v585_v33 = vld [vmem:[#allocation3 + $0x210] sm:$0xff]  ;;  %v586_v34 = vld [vmem:[#allocation3 + $0x218] sm:$0xff] }
  0x52   :  { %v507_v54 = vmul.f32 %v490_v44, %v481_v36  ;;  %v508_v55 = vmul.f32 %v494_v45, %v482_v41  ;;  %v509_v56 = vmul.f32 %v498_v46, %v483_v42  ;;  %v510_v57 = vmul.f32 %v502_v47, %v484_v43  ;;  %v621_v39 = vld [vmem:[#allocation5 + $0x44] sm:$0xf]  ;;  %v617_v44 = vld [vmem:[#allocation3 + $0x220] sm:$0xff] }
  0x53   :  { %v524_v61 = vrot.slane %v519_v48, %v827_v2  ;;  %v528_v62 = vrot.slane %v519_v48, %v829_v3  ;;  %v532_v63 = vrot.slane %v519_v48, %v831_v4  ;;  %v536_v0 = vrot.slane %v519_v48, %v833_v5 }
  0x54   :  { %v511_v6 = vadd.f32 %v507_v54, %v477_v49  ;;  %v512_v7 = vadd.f32 %v508_v55, %v478_v50  ;;  %v513_v8 = vadd.f32 %v509_v56, %v479_v51  ;;  %v514_v9 = vadd.f32 %v510_v57, %v480_v52  ;;  %v618_v49 = vld [vmem:[#allocation3 + $0x228] sm:$0xff]  ;;  %v619_v50 = vld [vmem:[#allocation3 + $0x230] sm:$0xff]  ;;  %v620_v51 = vld [vmem:[#allocation3 + $0x238] sm:$0xff] }
  0x55   :  { %v541_v11 = vmul.f32 %v524_v61, %v515_v53  ;;  %v542_v12 = vmul.f32 %v528_v62, %v516_v58  ;;  %v543_v13 = vmul.f32 %v532_v63, %v517_v59  ;;  %v544_v14 = vmul.f32 %v536_v0, %v518_v60  ;;  %v655_v56 = vld [vmem:[#allocation5 + $0x48] sm:$0xf] }
  0x56   :  { %v558_v18 = vrot.slane %v553_v1, %v827_v2  ;;  %v562_v19 = vrot.slane %v553_v1, %v829_v3  ;;  %v566_v20 = vrot.slane %v553_v1, %v831_v4  ;;  %v570_v21 = vrot.slane %v553_v1, %v833_v5  ;;  %v651_v61 = vld [vmem:[#allocation3 + $0x240] sm:$0xff] }
  0x57   :  { %v545_v23 = vadd.f32 %v541_v11, %v511_v6  ;;  %v546_v24 = vadd.f32 %v542_v12, %v512_v7  ;;  %v547_v25 = vadd.f32 %v543_v13, %v513_v8  ;;  %v548_v26 = vadd.f32 %v544_v14, %v514_v9  ;;  %v652_v6 = vld [vmem:[#allocation3 + $0x248] sm:$0xff]  ;;  %v653_v7 = vld [vmem:[#allocation3 + $0x250] sm:$0xff]  ;;  %v654_v8 = vld [vmem:[#allocation3 + $0x258] sm:$0xff] }
  0x58   :  { %v575_v28 = vmul.f32 %v558_v18, %v549_v10  ;;  %v576_v29 = vmul.f32 %v562_v19, %v550_v15  ;;  %v577_v30 = vmul.f32 %v566_v20, %v551_v16  ;;  %v578_v31 = vmul.f32 %v570_v21, %v552_v17  ;;  %v693_v13 = vld [vmem:[#allocation5 + $0x4c] sm:$0x7] }
  0x59   :  { %v592_v35 = vrot.slane %v587_v22, %v827_v2  ;;  %v596_v36 = vrot.slane %v587_v22, %v829_v3  ;;  %v600_v37 = vrot.slane %v587_v22, %v831_v4  ;;  %v604_v38 = vrot.slane %v587_v22, %v833_v5  ;;  %v690_v22 = vld [vmem:[#allocation3 + $0x260] sm:$0xff] }
  0x5a   :  { %v579_v40 = vadd.f32 %v575_v28, %v545_v23  ;;  %v580_v41 = vadd.f32 %v576_v29, %v546_v24  ;;  %v581_v42 = vadd.f32 %v577_v30, %v547_v25  ;;  %v582_v43 = vadd.f32 %v578_v31, %v548_v26  ;;  %v691_v23 = vld [vmem:[#allocation3 + $0x268] sm:$0xff]  ;;  %v692_v24 = vld [vmem:[#allocation3 + $0x270] sm:$0xff] }
  0x5b   :  { %v609_v45 = vmul.f32 %v592_v35, %v583_v27  ;;  %v610_v46 = vmul.f32 %v596_v36, %v584_v32  ;;  %v611_v47 = vmul.f32 %v600_v37, %v585_v33  ;;  %v612_v48 = vmul.f32 %v604_v38, %v586_v34 }
  0x5c   :  { %v626_v52 = vrot.slane %v621_v39, %v827_v2  ;;  %v630_v53 = vrot.slane %v621_v39, %v829_v3  ;;  %v634_v54 = vrot.slane %v621_v39, %v831_v4  ;;  %v638_v55 = vrot.slane %v621_v39, %v833_v5 }
  0x5d   :  { %v613_v57 = vadd.f32 %v609_v45, %v579_v40  ;;  %v614_v58 = vadd.f32 %v610_v46, %v580_v41  ;;  %v615_v59 = vadd.f32 %v611_v47, %v581_v42  ;;  %v616_v60 = vadd.f32 %v612_v48, %v582_v43 }
  0x5e   :  { %v643_v62 = vmul.f32 %v626_v52, %v617_v44  ;;  %v644_v63 = vmul.f32 %v630_v53, %v618_v49  ;;  %v645_v0 = vmul.f32 %v634_v54, %v619_v50  ;;  %v646_v1 = vmul.f32 %v638_v55, %v620_v51 }
  0x5f   :  { %v660_v9 = vrot.slane %v655_v56, %v827_v2  ;;  %v664_v10 = vrot.slane %v655_v56, %v829_v3  ;;  %v668_v11 = vrot.slane %v655_v56, %v831_v4  ;;  %v672_v12 = vrot.slane %v655_v56, %v833_v5 }
  0x60   :  { %v647_v14 = vadd.f32 %v643_v62, %v613_v57  ;;  %v648_v15 = vadd.f32 %v644_v63, %v614_v58  ;;  %v649_v16 = vadd.f32 %v645_v0, %v615_v59  ;;  %v650_v17 = vadd.f32 %v646_v1, %v616_v60 }
  0x61   :  { %v677_v18 = vmul.f32 %v660_v9, %v651_v61  ;;  %v678_v19 = vmul.f32 %v664_v10, %v652_v6  ;;  %v679_v20 = vmul.f32 %v668_v11, %v653_v7  ;;  %v680_v21 = vmul.f32 %v672_v12, %v654_v8 }
  0x62   :  { %v698_v25 = vrot.slane %v693_v13, %v827_v2  ;;  %v702_v26 = vrot.slane %v693_v13, %v829_v3  ;;  %v706_v27 = vrot.slane %v693_v13, %v831_v4  ;;  %v721_v4 = vstv %s922_s2 }
  0x63   :  { %v681_v28 = vadd.f32 %v677_v18, %v647_v14  ;;  %v682_v5 = vadd.f32 %v678_v19, %v648_v15  ;;  %v683_v29 = vadd.f32 %v679_v20, %v649_v16  ;;  %v684_v33 = vadd.f32 %v680_v21, %v650_v17 }
  0x64   :  { %v710_v30 = vmul.f32 %v698_v25, %v690_v22  ;;  %v711_v31 = vmul.f32 %v702_v26, %v691_v23  ;;  %v712_v32 = vmul.f32 %v706_v27, %v692_v24 }
  0x65   :  { %v685_v34 = vadd.f32 %v682_v5, %v681_v28 }
  0x66   :  { %v713_v36 = vadd.f32 %v711_v31, %v710_v30  ;;  %v715_v37 = vsel %vm714_vm0, %v712_v32, 0.0 }
  0x67   :  { %v686_v35 = vadd.f32 %v685_v34, %v683_v29 }
  0x68   :  { %v716_v39 = vadd.f32 %v715_v37, %v713_v36 }
  0x69   :  { %v687_v38 = vadd.f32 %v686_v35, %v684_v33 }
  0x6b   :  { %688 = vadd.xlane.f32.xlu0 %v687_v38 }
  0x6f   :  { %717 = vadd.xlane.f32.xlu0 %v716_v39 }
  0xf8   :  { %v689_v2 = vpop.xlane.xlu0 %688 }
  0xfc   :  { %v718_v3 = vpop.xlane.xlu0 %717 }
  0xfd   :  { %v719_v40 = vadd.f32 %v718_v3, %v689_v2 }
  0xff   :  { %v722_v41 = vadd.f32 %v721_v4, %v719_v40 }
 0x101   :  { %724 = vst.msk [vmem:[%s923_s3] sm:$0xff] %vm723_vm1, %v722_v41 }
 0x102   :  { %729 = vsyncpa [#allocation4], 1 }
 0x103   :  { %730 = vsyncpa [#allocation6], 1 }

</bundles_post_ra>
